<compile_context>
chip_gen: v7x
topology: tpu7x:2x2x1
jax: 0.10.0
libtpu: 0.0.40
codegen_flags: <defaults>
</compile_context>

<pallas_src>
import functools

import jax
import jax.numpy as jnp
from jax import lax
from jax.experimental import pallas as pl
from jax.experimental.pallas import tpu as pltpu

SMOOTH = 1e-07


def _dice_kernel(x_ref, t_ref, num_ref, den_ref, *, l_total, tile_l,
                 tiles_per_split, needs_any_mask):
    i = pl.program_id(0)   # split axis ("parallel"; one per TC on v7x)
    j = pl.program_id(1)   # L-tile within the split ("arbitrary" reduction)

    @pl.when(j == 0)
    def _():
        num_ref[...] = jnp.zeros_like(num_ref)
        den_ref[...] = jnp.zeros_like(den_ref)

    # Upcast in-kernel; inputs may arrive as bf16 (halves HBM traffic).
    x = x_ref[...].astype(jnp.float32)
    t = t_ref[...].astype(jnp.float32)
    p = jax.nn.sigmoid(x)

    num_t = p * t
    den_t = p + t

    n_slices = tile_l // 128

    def fold(v):
        # Deferred cross-lane reduction: fold the (N, tile_l) tile into an
        # (N, 128) partial using lane-aligned static slices (pure VPU vreg
        # adds; no per-step XLU reduce, no relayout).
        part = v[:, 0:128]
        for k in range(1, n_slices):
            part = part + v[:, k * 128:(k + 1) * 128]
        return part

    if needs_any_mask:
        block_idx = i * tiles_per_split + j
        needs_mask = (block_idx + 1) * tile_l > l_total

        # Hot path: full interior tile, no iota/compare/select work.
        @pl.when(jnp.logical_not(needs_mask))
        def _():
            num_ref[...] += fold(num_t)
            den_ref[...] += fold(den_t)

        # Cold path: partial edge tile or clamped fully-OOB tile.
        @pl.when(needs_mask)
        def _():
            col = block_idx * tile_l + lax.broadcasted_iota(
                jnp.int32, x.shape, 1)
            valid = col < l_total
            num_ref[...] += fold(jnp.where(valid, num_t, 0.0))
            den_ref[...] += fold(jnp.where(valid, den_t, 0.0))
    else:
        # Static specialization: every tile of every split is fully in-bounds.
        num_ref[...] += fold(num_t)
        den_ref[...] += fold(den_t)


@functools.partial(jax.jit, static_argnames=("tile_l",))
def dice_loss(inputs, targets, num_masks, *, tile_l=None):
    n = inputs.shape[0]
    x = inputs.reshape(n, -1)      # metadata-only reshape; no extra HBM pass
    t = targets.reshape(n, -1)
    l = x.shape[1]

    if tile_l is None:
        # Size the L tile so (2 inputs x 2 pipeline buffers + f32 temporaries)
        # stays well under scoped VMEM on every generation (v7x has only
        # 64 MiB total VMEM per TC).  Account for sublane padding of small N.
        budget = 16 * 1024 * 1024
        bx = jnp.dtype(x.dtype).itemsize
        bt = jnp.dtype(t.dtype).itemsize
        pad_n = -(-n // 8) * 8
        per_col = pad_n * (2 * (bx + bt) + 6 * 4)
        tile_l = max(128, budget // per_col)
        tile_l = min(tile_l, 8192)   # bound the in-kernel unroll (tile_l//128)

    l_up = pl.cdiv(l, 128) * 128
    tl = max(128, (min(int(tile_l), l_up) // 128) * 128)

    total_tiles = pl.cdiv(l, tl)
    n_splits = 2 if total_tiles >= 2 else 1          # use both TCs on v7x
    tiles_per_split = pl.cdiv(total_tiles, n_splits)

    # Any partial edge tile, or clamped out-of-range tiles from an uneven
    # split, require the in-kernel mask.  Otherwise it is statically removed.
    needs_any_mask = (l % tl != 0) or (tiles_per_split * n_splits != total_tiles)

    def in_map(i, j):
        # Clamp fully-out-of-bounds blocks (odd tile counts); they are zeroed
        # by the in-kernel mask.
        return (0, jnp.minimum(i * tiles_per_split + j, total_tiles - 1))

    kernel = functools.partial(
        _dice_kernel, l_total=l, tile_l=tl, tiles_per_split=tiles_per_split,
        needs_any_mask=needs_any_mask)

    out_num, out_den = pl.pallas_call(
        kernel,
        out_shape=(
            jax.ShapeDtypeStruct((n_splits, n, 128), jnp.float32),
            jax.ShapeDtypeStruct((n_splits, n, 128), jnp.float32),
        ),
        grid_spec=pltpu.PrefetchScalarGridSpec(
            num_scalar_prefetch=0,
            grid=(n_splits, tiles_per_split),
            in_specs=[
                pl.BlockSpec((n, tl), in_map),
                pl.BlockSpec((n, tl), in_map),
            ],
            out_specs=(
                pl.BlockSpec((None, n, 128), lambda i, j: (i, 0, 0)),
                pl.BlockSpec((None, n, 128), lambda i, j: (i, 0, 0)),
            ),
        ),
        compiler_params=pltpu.CompilerParams(
            dimension_semantics=("parallel", "arbitrary"),
            vmem_limit_bytes=48 * 1024 * 1024,
        ),
    )(x, t)

    # Tiny epilogue in the wrapper (lane-dense kernel outputs, no in-kernel
    # scalar store).
    num = jnp.sum(out_num, axis=(0, 2))              # (n,)
    den = jnp.sum(out_den, axis=(0, 2))              # (n,)
    loss = 1.0 - (2.0 * num + SMOOTH) / (den + SMOOTH)
    return jnp.sum(loss) / num_masks


def dice_loss_ref(inputs, targets, num_masks):
    x = jax.nn.sigmoid(inputs.astype(jnp.float32)).reshape(inputs.shape[0], -1)
    t = targets.astype(jnp.float32).reshape(targets.shape[0], -1)
    numerator = 2.0 * jnp.sum(x * t, axis=1)
    denominator = jnp.sum(x, axis=1) + jnp.sum(t, axis=1)
    loss = 1.0 - (numerator + SMOOTH) / (denominator + SMOOTH)
    return jnp.sum(loss) / num_masks


if __name__ == "__main__":
    key = jax.random.PRNGKey(0)

    cases = [
        # (shape, num_masks, dtype, tile_l)
        ((2, 4, 16, 16), 2, jnp.float32, None),   # single tile, static no-mask path
        ((2, 3, 17, 19), 3, jnp.float32, 256),    # partial edge tile + 2-way split
        ((2, 5, 16, 16), 2, jnp.float32, 256),    # odd tile count (clamped OOB block)
        ((2, 4, 16, 16), 2, jnp.bfloat16, None),  # native bf16 streaming
    ]
    for idx, (shape, num_masks, dtype, tile_l) in enumerate(cases):
        k1, k2 = jax.random.split(jax.random.fold_in(key, idx))
        inputs = jax.random.normal(k1, shape, dtype=jnp.float32).astype(dtype)
        targets = (jax.random.uniform(k2, shape) > 0.5).astype(dtype)

        out = dice_loss(inputs, targets, num_masks, tile_l=tile_l)
        out = jax.block_until_ready(out)
        ref = dice_loss_ref(inputs, targets, num_masks)
        assert jnp.allclose(out, ref, atol=1e-5, rtol=1e-5), (shape, str(dtype), out, ref)

    print("KERNEL_OK")
</pallas_src>

<mosaic_0001>
module attributes {stable_mosaic.version = 11 : i64} {
  func.func @_dice_kernel(%arg0: i32, %arg1: i32, %arg2: memref<2x1024xf32, #tpu.memory_space<vmem>>, %arg3: memref<2x1024xf32, #tpu.memory_space<vmem>>, %arg4: memref<1x2x128xf32, #tpu.memory_space<vmem>>, %arg5: memref<1x2x128xf32, #tpu.memory_space<vmem>>) attributes {dimension_semantics = [#tpu.dimension_semantics<parallel>, #tpu.dimension_semantics<arbitrary>], iteration_bounds = array<i64: 1, 1>, scalar_prefetch = 0 : i64, scratch_operands = 0 : i64, tpu.core_type = #tpu.core_type<tc>, window_params = [{transform_indices = @transform_0, window_bounds = array<i64: 2, 1024>}, {transform_indices = @transform_1, window_bounds = array<i64: 2, 1024>}, {transform_indices = @transform_2, window_bounds = array<i64: 1, 2, 128>}, {transform_indices = @transform_3, window_bounds = array<i64: 1, 2, 128>}]} {
    %c0_i32 = arith.constant 0 : i32
    %0 = arith.cmpi eq, %arg1, %c0_i32 : i32
    %1 = arith.extui %0 : i1 to i32
    %c0_i32_0 = arith.constant 0 : i32
    %2 = arith.cmpi ne, %1, %c0_i32_0 : i32
    scf.if %2 {
      %cst_16 = arith.constant 0.000000e+00 : f32
      %54 = vector.broadcast %cst_16 : f32 to vector<2x128xf32>
      %c0_17 = arith.constant 0 : index
      %c0_18 = arith.constant 0 : index
      %c0_19 = arith.constant 0 : index
      %55 = vector.load %arg4[%c0_17, %c0_18, %c0_19] : memref<1x2x128xf32, #tpu.memory_space<vmem>>, vector<1x2x128xf32>
      %56 = vector.shape_cast %55 : vector<1x2x128xf32> to vector<2x128xf32>
      %57 = vector.shape_cast %54 : vector<2x128xf32> to vector<1x2x128xf32>
      tpu.vector_store %arg4[%c0_17, %c0_18, %c0_19], %57 {strides = array<i32>} : memref<1x2x128xf32, #tpu.memory_space<vmem>>, vector<1x2x128xf32>,
      %cst_20 = arith.constant 0.000000e+00 : f32
      %58 = vector.broadcast %cst_20 : f32 to vector<2x128xf32>
      %c0_21 = arith.constant 0 : index
      %c0_22 = arith.constant 0 : index
      %c0_23 = arith.constant 0 : index
      %59 = vector.load %arg5[%c0_21, %c0_22, %c0_23] : memref<1x2x128xf32, #tpu.memory_space<vmem>>, vector<1x2x128xf32>
      %60 = vector.shape_cast %59 : vector<1x2x128xf32> to vector<2x128xf32>
      %61 = vector.shape_cast %58 : vector<2x128xf32> to vector<1x2x128xf32>
      tpu.vector_store %arg5[%c0_21, %c0_22, %c0_23], %61 {strides = array<i32>} : memref<1x2x128xf32, #tpu.memory_space<vmem>>, vector<1x2x128xf32>,
    } else {
    }
    %c0 = arith.constant 0 : index
    %c0_1 = arith.constant 0 : index
    %3 = vector.load %arg2[%c0, %c0_1] : memref<2x1024xf32, #tpu.memory_space<vmem>>, vector<2x1024xf32>
    %c0_2 = arith.constant 0 : index
    %c0_3 = arith.constant 0 : index
    %4 = vector.load %arg3[%c0_2, %c0_3] : memref<2x1024xf32, #tpu.memory_space<vmem>>, vector<2x1024xf32>
    %5 = arith.negf %3 : vector<2x1024xf32>
    %6 = math.exp %5 : vector<2x1024xf32>
    %cst = arith.constant 1.000000e+00 : f32
    %7 = vector.broadcast %cst : f32 to vector<2x1024xf32>
    %8 = arith.addf %7, %6 : vector<2x1024xf32>
    %9 = arith.divf %7, %8 : vector<2x1024xf32>
    %10 = arith.mulf %9, %4 : vector<2x1024xf32>
    %11 = arith.addf %9, %4 : vector<2x1024xf32>
    %c0_4 = arith.constant 0 : index
    %c0_5 = arith.constant 0 : index
    %c0_6 = arith.constant 0 : index
    %12 = vector.load %arg4[%c0_4, %c0_5, %c0_6] : memref<1x2x128xf32, #tpu.memory_space<vmem>>, vector<1x2x128xf32>
    %13 = vector.shape_cast %12 : vector<1x2x128xf32> to vector<2x128xf32>
    %14 = vector.extract_strided_slice %10 {offsets = [0, 0], sizes = [2, 128], strides = [1, 1]} : vector<2x1024xf32> to vector<2x128xf32>
    %15 = vector.extract_strided_slice %10 {offsets = [0, 128], sizes = [2, 128], strides = [1, 1]} : vector<2x1024xf32> to vector<2x128xf32>
    %16 = arith.addf %14, %15 : vector<2x128xf32>
    %17 = vector.extract_strided_slice %10 {offsets = [0, 256], sizes = [2, 128], strides = [1, 1]} : vector<2x1024xf32> to vector<2x128xf32>
    %18 = arith.addf %16, %17 : vector<2x128xf32>
    %19 = vector.extract_strided_slice %10 {offsets = [0, 384], sizes = [2, 128], strides = [1, 1]} : vector<2x1024xf32> to vector<2x128xf32>
    %20 = arith.addf %18, %19 : vector<2x128xf32>
    %21 = vector.extract_strided_slice %10 {offsets = [0, 512], sizes = [2, 128], strides = [1, 1]} : vector<2x1024xf32> to vector<2x128xf32>
    %22 = arith.addf %20, %21 : vector<2x128xf32>
    %23 = vector.extract_strided_slice %10 {offsets = [0, 640], sizes = [2, 128], strides = [1, 1]} : vector<2x1024xf32> to vector<2x128xf32>
    %24 = arith.addf %22, %23 : vector<2x128xf32>
    %25 = vector.extract_strided_slice %10 {offsets = [0, 768], sizes = [2, 128], strides = [1, 1]} : vector<2x1024xf32> to vector<2x128xf32>
    %26 = arith.addf %24, %25 : vector<2x128xf32>
    %27 = vector.extract_strided_slice %10 {offsets = [0, 896], sizes = [2, 128], strides = [1, 1]} : vector<2x1024xf32> to vector<2x128xf32>
    %28 = arith.addf %26, %27 : vector<2x128xf32>
    %29 = arith.addf %13, %28 : vector<2x128xf32>
    %c0_7 = arith.constant 0 : index
    %c0_8 = arith.constant 0 : index
    %c0_9 = arith.constant 0 : index
    %30 = vector.load %arg4[%c0_7, %c0_8, %c0_9] : memref<1x2x128xf32, #tpu.memory_space<vmem>>, vector<1x2x128xf32>
    %31 = vector.shape_cast %30 : vector<1x2x128xf32> to vector<2x128xf32>
    %32 = vector.shape_cast %29 : vector<2x128xf32> to vector<1x2x128xf32>
    tpu.vector_store %arg4[%c0_7, %c0_8, %c0_9], %32 {strides = array<i32>} : memref<1x2x128xf32, #tpu.memory_space<vmem>>, vector<1x2x128xf32>,
    %c0_10 = arith.constant 0 : index
    %c0_11 = arith.constant 0 : index
    %c0_12 = arith.constant 0 : index
    %33 = vector.load %arg5[%c0_10, %c0_11, %c0_12] : memref<1x2x128xf32, #tpu.memory_space<vmem>>, vector<1x2x128xf32>
    %34 = vector.shape_cast %33 : vector<1x2x128xf32> to vector<2x128xf32>
    %35 = vector.extract_strided_slice %11 {offsets = [0, 0], sizes = [2, 128], strides = [1, 1]} : vector<2x1024xf32> to vector<2x128xf32>
    %36 = vector.extract_strided_slice %11 {offsets = [0, 128], sizes = [2, 128], strides = [1, 1]} : vector<2x1024xf32> to vector<2x128xf32>
    %37 = arith.addf %35, %36 : vector<2x128xf32>
    %38 = vector.extract_strided_slice %11 {offsets = [0, 256], sizes = [2, 128], strides = [1, 1]} : vector<2x1024xf32> to vector<2x128xf32>
    %39 = arith.addf %37, %38 : vector<2x128xf32>
    %40 = vector.extract_strided_slice %11 {offsets = [0, 384], sizes = [2, 128], strides = [1, 1]} : vector<2x1024xf32> to vector<2x128xf32>
    %41 = arith.addf %39, %40 : vector<2x128xf32>
    %42 = vector.extract_strided_slice %11 {offsets = [0, 512], sizes = [2, 128], strides = [1, 1]} : vector<2x1024xf32> to vector<2x128xf32>
    %43 = arith.addf %41, %42 : vector<2x128xf32>
    %44 = vector.extract_strided_slice %11 {offsets = [0, 640], sizes = [2, 128], strides = [1, 1]} : vector<2x1024xf32> to vector<2x128xf32>
    %45 = arith.addf %43, %44 : vector<2x128xf32>
    %46 = vector.extract_strided_slice %11 {offsets = [0, 768], sizes = [2, 128], strides = [1, 1]} : vector<2x1024xf32> to vector<2x128xf32>
    %47 = arith.addf %45, %46 : vector<2x128xf32>
    %48 = vector.extract_strided_slice %11 {offsets = [0, 896], sizes = [2, 128], strides = [1, 1]} : vector<2x1024xf32> to vector<2x128xf32>
    %49 = arith.addf %47, %48 : vector<2x128xf32>
    %50 = arith.addf %34, %49 : vector<2x128xf32>
    %c0_13 = arith.constant 0 : index
    %c0_14 = arith.constant 0 : index
    %c0_15 = arith.constant 0 : index
    %51 = vector.load %arg5[%c0_13, %c0_14, %c0_15] : memref<1x2x128xf32, #tpu.memory_space<vmem>>, vector<1x2x128xf32>
    %52 = vector.shape_cast %51 : vector<1x2x128xf32> to vector<2x128xf32>
    %53 = vector.shape_cast %50 : vector<2x128xf32> to vector<1x2x128xf32>
    tpu.vector_store %arg5[%c0_13, %c0_14, %c0_15], %53 {strides = array<i32>} : memref<1x2x128xf32, #tpu.memory_space<vmem>>, vector<1x2x128xf32>,
    return
  }
  func.func @transform_0(%arg0: i32, %arg1: i32) -> (i32, i32) {
    %c1_i32 = arith.constant 1 : i32
    %0 = arith.muli %arg0, %c1_i32 : i32
    %1 = arith.addi %0, %arg1 : i32
    %c0_i32 = arith.constant 0 : i32
    %2 = arith.minsi %1, %c0_i32 : i32
    %c0_i32_0 = arith.constant 0 : i32
    %c0_i32_1 = arith.constant 0 : i32
    return %c0_i32_0, %2 : i32, i32
  }
  func.func @transform_1(%arg0: i32, %arg1: i32) -> (i32, i32) {
    %c1_i32 = arith.constant 1 : i32
    %0 = arith.muli %arg0, %c1_i32 : i32
    %1 = arith.addi %0, %arg1 : i32
    %c0_i32 = arith.constant 0 : i32
    %2 = arith.minsi %1, %c0_i32 : i32
    %c0_i32_0 = arith.constant 0 : i32
    %c0_i32_1 = arith.constant 0 : i32
    return %c0_i32_0, %2 : i32, i32
  }
  func.func @transform_2(%arg0: i32, %arg1: i32) -> (i32, i32, i32) {
    %c0_i32 = arith.constant 0 : i32
    %c0_i32_0 = arith.constant 0 : i32
    %c0_i32_1 = arith.constant 0 : i32
    return %arg0, %c0_i32, %c0_i32_0 : i32, i32, i32
  }
  func.func @transform_3(%arg0: i32, %arg1: i32) -> (i32, i32, i32) {
    %c0_i32 = arith.constant 0 : i32
    %c0_i32_0 = arith.constant 0 : i32
    %c0_i32_1 = arith.constant 0 : i32
    return %arg0, %c0_i32, %c0_i32_0 : i32, i32, i32
  }
}

</mosaic_0001>

<bundles_post_ra>
// kernel: dice_loss.1
= control target key start
LH: loop header
LB: loop body
LE: loop exit
PB: predicated region body
PF: predicated region fallthrough
CT: control target
= control target key end

     0   :  { %v182_v0 = vmov 0.0   ;;  %s233_s2 = inlined_call_operand.vmem [shape: f32[1,2,128], index: 2, kind: output, shape index: {0}]   ;;  %s234_s3 = inlined_call_operand.vmem [shape: f32[1,2,128], index: 3, kind: output, shape index: {1}]   ;;  %s235_s0 = inlined_call_operand.vmem [shape: f32[2,1024], index: 0, kind: input, shape index: {}]   ;;  %s236_s1 = inlined_call_operand.vmem [shape: f32[2,1024], index: 1, kind: input, shape index: {}]  }
   0x1   :  { %81 = vst [vmem:[%s233_s2] sm:$0x3] %v182_v0  ;;  %82 = vst [vmem:[%s234_s3] sm:$0x3] %v182_v0  ;;  %v83_v1 = vld [vmem:[%s235_s0] sm:$0xff]  ;;  %v84_v2 = vld [vmem:[%s235_s0 + $0x8] sm:$0xff] }
   0x2   :  { %v171_v3 = vmul.f32 -1.442695, %v83_v1  ;;  %v172_v4 = vmul.f32 -1.442695, %v84_v2  ;;  %v85_v9 = vld [vmem:[%s236_s1] sm:$0xff]  ;;  %v86_v12 = vld [vmem:[%s236_s1 + $0x8] sm:$0xff] }
   0x4   :  { %174 = vpow2.f32 %v171_v3 }
   0x5   :  { %176 = vpow2.f32 %v172_v4 }
   0x8   :  { %v103_v41 = vld [vmem:[%s233_s2] sm:$0x3] }
   0x9   :  { %v127_v42 = vld [vmem:[%s234_s3] sm:$0x3] }
   0xe   :  { %v175_v5 = vpop.eup %174 }
   0xf   :  { %v177_v6 = vpop.eup %176  ;;  %v93_v7 = vadd.f32 1.0, %v175_v5 }
  0x10   :  { %v94_v8 = vadd.f32 1.0, %v177_v6 }
  0x11   :  { %178 = vrcp.f32 %v93_v7 }
  0x12   :  { %180 = vrcp.f32 %v94_v8 }
  0x1b   :  { %v179_v10 = vpop.eup %178 }
  0x1c   :  { %v181_v11 = vpop.eup %180  ;;  %v99_v13 = vmul.f32 %v179_v10, %v85_v9  ;;  %v101_v14 = vadd.f32 %v179_v10, %v85_v9 }
  0x1d   :  { %v100_v18 = vmul.f32 %v181_v11, %v86_v12  ;;  %v102_v19 = vadd.f32 %v181_v11, %v86_v12 }
  0x1e   :  { %v105_v15 = vrot.slane %v99_v13, 2  ;;  %v108_v16 = vrot.slane %v99_v13, 4  ;;  %v129_v17 = vrot.slane %v101_v14, 2  ;;  %v132_v20 = vrot.slane %v101_v14, 4 }
  0x1f   :  { %v111_v22 = vrot.slane %v99_v13, 6  ;;  %v135_v24 = vrot.slane %v101_v14, 6  ;;  %v116_v28 = vrot.slane %v100_v18, 2  ;;  %v140_v30 = vrot.slane %v102_v19, 2 }
  0x20   :  { %v107_v21 = vadd.f32 %v105_v15, %v99_v13  ;;  %v131_v23 = vadd.f32 %v129_v17, %v101_v14  ;;  %v119_v32 = vrot.slane %v100_v18, 4  ;;  %v143_v34 = vrot.slane %v102_v19, 4 }
  0x21   :  { %v122_v36 = vrot.slane %v100_v18, 6  ;;  %v146_v38 = vrot.slane %v102_v19, 6 }
  0x22   :  { %v110_v25 = vadd.f32 %v108_v16, %v107_v21  ;;  %v134_v26 = vadd.f32 %v132_v20, %v131_v23 }
  0x24   :  { %v113_v27 = vadd.f32 %v111_v22, %v110_v25  ;;  %v137_v29 = vadd.f32 %v135_v24, %v134_v26 }
  0x26   :  { %v114_v31 = vadd.f32 %v113_v27, %v100_v18  ;;  %v138_v33 = vadd.f32 %v137_v29, %v102_v19 }
  0x28   :  { %v118_v35 = vadd.f32 %v116_v28, %v114_v31  ;;  %v142_v37 = vadd.f32 %v140_v30, %v138_v33 }
  0x2a   :  { %v121_v39 = vadd.f32 %v119_v32, %v118_v35  ;;  %v145_v40 = vadd.f32 %v143_v34, %v142_v37 }
  0x2c   :  { %v124_v43 = vadd.f32 %v122_v36, %v121_v39  ;;  %v148_v44 = vadd.f32 %v146_v38, %v145_v40 }
  0x2e   :  { %v125_v45 = vadd.f32 %v124_v43, %v103_v41  ;;  %v149_v46 = vadd.f32 %v148_v44, %v127_v42 }
  0x30   :  { %126 = vst [vmem:[%s233_s2] sm:$0x3] %v125_v45  ;;  %150 = vst [vmem:[%s234_s3] sm:$0x3] %v149_v46 }

</bundles_post_ra>
